<compile_context>
chip_gen: v7x
topology: tpu7x:2x2x1
jax: 0.10.0
libtpu: 0.0.40
codegen_flags: <defaults>
</compile_context>

<pallas_src>
import functools

import jax
import jax.numpy as jnp
from jax.experimental import pallas as pl
from jax.experimental.pallas import tpu as pltpu

EPS = 1e-12


def _round_up(n, m):
    return (n + m - 1) // m * m


# -----------------------------------------------------------------------------
# Kernel bodies.  Both take the same operands:
#   alpha_ref : (T*S,)            f32 SMEM   per-task mixing coefficients
#   x_ref     : (1, M, I_p)       bf16       all rows of one task (M = repeats*L_p)
#   comb_ref  : (S+1, I_p, bo)    bf16       slab 0 = W.T tile, slabs 1..S = skills
#   b_ref     : (1, bo)           f32        bias tile
#   o_ref     : (1, M, bo)        f32        output tile
# grid = (num_o_tiles, T): j = pl.program_id(0) O tile, t = pl.program_id(1) task.
# -----------------------------------------------------------------------------
def _matmul_first_kernel(alpha_ref, x_ref, comb_ref, b_ref, o_ref):
    # Small-M regime: put the skill reduction on the (near idle) MXU; VPU work
    # is only S scale+add passes over the small (M, bo) output tile.
    t = pl.program_id(1)
    n_skills = comb_ref.shape[0] - 1
    x = x_ref[0]                                                    # (M, I_p) bf16
    acc = jnp.dot(x, comb_ref[0], preferred_element_type=jnp.float32)
    for s in range(n_skills):                                       # unrolled, S small
        a = alpha_ref[t * n_skills + s]                              # f32 scalar (SMEM)
        y = jnp.dot(x, comb_ref[s + 1], preferred_element_type=jnp.float32)
        acc = acc + a * y
    o_ref[0] = (acc + b_ref[...]).astype(o_ref.dtype)


def _mixing_first_kernel(alpha_ref, x_ref, comb_ref, b_ref, o_ref):
    # Large-M regime: mix the per-task weight tile once (bf16 VPU FMAs --
    # v6e/v7x have a bf16 VALU; on v5e f32-resident weights would be the
    # better trade), then ONE MXU matmul over all M rows of the task.
    t = pl.program_id(1)
    n_skills = comb_ref.shape[0] - 1
    w_mix = comb_ref[0]                                              # (I_p, bo) bf16
    for s in range(n_skills):                                        # unrolled, S small
        a = alpha_ref[t * n_skills + s].astype(jnp.bfloat16)
        w_mix = w_mix + a * comb_ref[s + 1]
    out = jnp.dot(x_ref[0], w_mix, preferred_element_type=jnp.float32)
    o_ref[0] = (out + b_ref[...]).astype(o_ref.dtype)


# -----------------------------------------------------------------------------
# Tiling / VMEM budgeting.
# -----------------------------------------------------------------------------
def _vmem_limit_bytes():
    # Budget from the chip's VMEM capacity (v5e/v6e: 128 MiB -> 96 MiB limit,
    # v7x: 64 MiB -> 48 MiB limit).  Falls back to the tightest (v7x) budget.
    try:
        cap = int(pltpu.get_tpu_info().vmem_capacity_bytes)
    except Exception:
        cap = 64 * 1024 * 1024
    return min(cap * 3 // 4, 96 * 1024 * 1024)


def _select_block_o(O_p, S, I_p, M, resident_budget):
    """Largest multiple of 128 that divides O_p and whose working set fits."""
    cands = [bo for bo in range(128, O_p + 1, 128) if O_p % bo == 0]

    def resident(bo):
        return ((S + 1) * I_p * bo * 2       # stacked [W.T, skills] tile (bf16)
                + M * I_p * 2                # x tile (bf16)
                + M * bo * 4                 # output tile (f32)
                + bo * 4)                    # bias tile (f32)

    block_o = 128
    for bo in cands:
        if resident(bo) <= resident_budget:  # budget already leaves 2x-buffer headroom
            block_o = bo
    # TODO(synk): if even resident(128) exceeded the budget (huge S*I_p), a
    # K(I)-tile grid axis with an f32 VMEM accumulator would be needed.

    # v7x megacore: prefer >=2 O tiles so the two TensorCores fetch disjoint
    # weight tiles (tiny grid-step overhead on 1-TC v5e/v6e).
    if block_o == O_p and O_p >= 256:
        smaller = [bo for bo in cands if bo < O_p]
        if smaller:
            block_o = max(smaller)
    return block_o


# -----------------------------------------------------------------------------
# Parameter prep (hoisted out of the per-call path -- run once per module).
# -----------------------------------------------------------------------------
def prepare_params(weight, bias, skills_dense, n_skills):
    """weight: (O, I) f32; bias: (O,) f32; skills_dense: (O*I, S) f32 (densified).

    Returns comb_p: (S+1, I_p, O_p) bf16 with slab 0 = W.T and slabs 1..S the
    skill matrices (the flat O*I axis is reinterpreted as (I, O), matching the
    module's `.view(B, in_features, out_features)`), and bias_p: (1, O_p) f32.
    """
    O, I = weight.shape
    I_p = _round_up(I, 128)
    O_p = _round_up(O, 128)
    skills3 = skills_dense.T.reshape(n_skills, I, O)                 # (S, I, O)
    comb = jnp.concatenate([weight.T[None], skills3], axis=0)        # (S+1, I, O)
    comb_p = jnp.pad(comb.astype(jnp.bfloat16),                      # cast BEFORE pad
                     ((0, 0), (0, I_p - I), (0, O_p - O)))
    bias_p = jnp.pad(bias, (0, O_p - O)).reshape(1, O_p).astype(jnp.float32)
    return comb_p, bias_p


# -----------------------------------------------------------------------------
# Per-call wrapper.
# -----------------------------------------------------------------------------
@functools.partial(jax.jit, static_argnames=("out_features", "matmul_first"))
def skilled_ltsft_linear(x, alpha_task, comb_p, bias_p, *, out_features,
                         matmul_first=None):
    """x: (B, L, I); alpha_task: (T, S) per-task coefficients (the module's
    per-batch alpha rows repeat every B//T batches thanks to repeat_interleave);
    comb_p/bias_p come from prepare_params()."""
    B, L, I = x.shape
    T, S = alpha_task.shape
    Sp1, I_p, O_p = comb_p.shape
    assert Sp1 == S + 1 and I <= I_p
    assert B % T == 0                        # the module asserts the same
    repeats = B // T

    L_p = _round_up(L, 16)                   # bf16 packs 16 rows per vreg sublane
    M = repeats * L_p                        # per-task MXU M dim

    vmem_limit = _vmem_limit_bytes()
    block_o = _select_block_o(O_p, S, I_p, M,
                              resident_budget=vmem_limit * 2 // 5)
    num_o = O_p // block_o

    # Per-call data prep: only x is touched (bf16 cast before pad), then
    # regrouped so each grid step sees all rows of one task.
    x_p = jnp.pad(x.astype(jnp.bfloat16),
                  ((0, 0), (0, L_p - L), (0, I_p - I))).reshape(T, M, I_p)
    alpha_flat = alpha_task.reshape(-1).astype(jnp.float32)          # (T*S,) -> SMEM

    if matmul_first is None:
        matmul_first = M <= I_p              # small-M regime: let the MXU reduce skills
    kernel = _matmul_first_kernel if matmul_first else _mixing_first_kernel

    out_p = pl.pallas_call(
        kernel,
        out_shape=jax.ShapeDtypeStruct((T, M, O_p), jnp.float32),
        grid=(num_o, T),                     # task innermost: each weight O-tile DMA'd once
        in_specs=[
            pl.BlockSpec(memory_space=pltpu.MemorySpace.SMEM),           # alpha (flat)
            pl.BlockSpec((1, M, I_p), lambda j, t: (t, 0, 0)),           # x rows of task t
            pl.BlockSpec((Sp1, I_p, block_o), lambda j, t: (0, 0, j)),   # [W.T, skills]
            pl.BlockSpec((1, block_o), lambda j, t: (0, j)),             # bias tile
        ],
        out_specs=pl.BlockSpec((1, M, block_o), lambda j, t: (t, 0, j)),
        compiler_params=pltpu.CompilerParams(
            dimension_semantics=("parallel", "parallel"),
            vmem_limit_bytes=vmem_limit),
    )(alpha_flat, x_p, comb_p, bias_p)

    # NOTE: callers that accept the padded, lane-dense layout can skip this slice.
    return out_p.reshape(B, L_p, O_p)[:, :L, :out_features]


# -----------------------------------------------------------------------------
# Deterministic example / test harness.
# -----------------------------------------------------------------------------
def build_params(key, n_tasks, n_skills, in_features, out_features, density):
    """Deterministic parameter init mirroring the module's __init__ shapes."""
    k_logits, k_w, k_b, k_mask, k_vals = jax.random.split(key, 5)

    # skill_logits ~ U(-0.001, 0.001), shape (n_tasks, n_skills)
    skill_logits = jax.random.uniform(
        k_logits, (n_tasks, n_skills), minval=-0.001, maxval=0.001,
        dtype=jnp.float32)

    # base weight / bias (nn.Linear-style init), shapes (O, I) and (O,)
    bound = 1.0 / (in_features ** 0.5)
    weight = jax.random.uniform(k_w, (out_features, in_features),
                                minval=-bound, maxval=bound, dtype=jnp.float32)
    bias = jax.random.uniform(k_b, (out_features,),
                              minval=-bound, maxval=bound, dtype=jnp.float32)

    # skills_weight: sparse (O*I, n_skills) with ~density nonzeros, kept dense.
    # NOTE: the PyTorch __init__ fills the sparse values with zeros; small
    # deterministic nonzero values are used so the skill path does real work.
    mask = (jax.random.uniform(k_mask, (out_features * in_features, n_skills))
            < density).astype(jnp.float32)
    vals = 0.02 * jax.random.normal(k_vals,
                                    (out_features * in_features, n_skills),
                                    dtype=jnp.float32)
    return skill_logits, weight, bias, mask * vals


def compute_alpha(skill_logits, task_ids):
    """Eval-mode gather + sigmoid + normalize, per task (per-batch rows repeat)."""
    logits = jax.nn.sigmoid(skill_logits[task_ids])                  # (T, S)
    return logits / (logits.sum(axis=-1, keepdims=True) + EPS)


if __name__ == "__main__":
    # Small, module-consistent shapes (padding path exercised: 96->128, 160->256).
    B, L = 4, 8
    in_features, out_features = 96, 160
    n_tasks, n_skills = 2, 4
    density = 0.1

    key = jax.random.PRNGKey(0)
    k_params, k_x = jax.random.split(key)
    skill_logits, weight, bias, skills_dense = build_params(
        k_params, n_tasks, n_skills, in_features, out_features, density)

    x = jax.random.normal(k_x, (B, L, in_features), dtype=jnp.float32)
    task_ids = jnp.array([0, 1], dtype=jnp.int32)                    # (T,), B % T == 0

    alpha_task = compute_alpha(skill_logits, task_ids)               # (T, S)
    comb_p, bias_p = prepare_params(weight, bias, skills_dense, n_skills)

    # Default regime (matmul-first at these shapes: M = 32 <= I_p = 128).
    out = skilled_ltsft_linear(x, alpha_task, comb_p, bias_p,
                               out_features=out_features)
    out = jax.block_until_ready(out)

    # Plain-JAX f32 reference of the PyTorch forward.
    repeats = B // task_ids.shape[0]
    alpha_b = jnp.repeat(alpha_task, repeats, axis=0)                # repeat_interleave
    base_ref = jnp.einsum("bli,oi->blo", x, weight) + bias
    Wflat = (skills_dense @ alpha_b.T).T.reshape(B, in_features, out_features)
    ref = base_ref + jnp.einsum("bli,bio->blo", x, Wflat)

    assert out.shape == (B, L, out_features)
    # bf16 MXU inputs with f32 accumulation -> bf16-level tolerance.
    err_a = float(jnp.max(jnp.abs(out - ref)))
    assert jnp.allclose(out, ref, rtol=5e-2, atol=5e-2), err_a

    # Also exercise the mixing-first (large-M) regime path.
    out_b = skilled_ltsft_linear(x, alpha_task, comb_p, bias_p,
                                 out_features=out_features, matmul_first=False)
    out_b = jax.block_until_ready(out_b)
    err_b = float(jnp.max(jnp.abs(out_b - ref)))
    assert jnp.allclose(out_b, ref, rtol=5e-2, atol=5e-2), err_b

    print("KERNEL_OK")
</pallas_src>

<mosaic_0001>
module attributes {stable_mosaic.version = 11 : i64} {
  func.func @_matmul_first_kernel(%arg0: i32, %arg1: i32, %arg2: memref<8xf32, #tpu.memory_space<smem>>, %arg3: memref<1x32x128xbf16, #tpu.memory_space<vmem>>, %arg4: memref<5x128x128xbf16, #tpu.memory_space<vmem>>, %arg5: memref<1x128xf32, #tpu.memory_space<vmem>>, %arg6: memref<1x32x128xf32, #tpu.memory_space<vmem>>) attributes {dimension_semantics = [#tpu.dimension_semantics<parallel>, #tpu.dimension_semantics<parallel>], iteration_bounds = array<i64: 2, 2>, scalar_prefetch = 0 : i64, scratch_operands = 0 : i64, tpu.core_type = #tpu.core_type<tc>, window_params = [{transform_indices = @transform_0, window_bounds = array<i64: 8>}, {transform_indices = @transform_1, window_bounds = array<i64: 1, 32, 128>}, {transform_indices = @transform_2, window_bounds = array<i64: 5, 128, 128>}, {transform_indices = @transform_3, window_bounds = array<i64: 1, 128>}, {transform_indices = @transform_4, window_bounds = array<i64: 1, 32, 128>}]} {
    %c0 = arith.constant 0 : index
    %c0_0 = arith.constant 0 : index
    %c0_1 = arith.constant 0 : index
    %0 = vector.load %arg3[%c0, %c0_0, %c0_1] : memref<1x32x128xbf16, #tpu.memory_space<vmem>>, vector<1x32x128xbf16>
    %1 = vector.shape_cast %0 : vector<1x32x128xbf16> to vector<32x128xbf16>
    %c0_2 = arith.constant 0 : index
    %c0_3 = arith.constant 0 : index
    %c0_4 = arith.constant 0 : index
    %2 = vector.load %arg4[%c0_2, %c0_3, %c0_4] : memref<5x128x128xbf16, #tpu.memory_space<vmem>>, vector<1x128x128xbf16>
    %3 = vector.shape_cast %2 : vector<1x128x128xbf16> to vector<128x128xbf16>
    %cst = arith.constant dense<0.000000e+00> : vector<32x128xf32>
    %4 = tpu.matmul %1, %3, %cst {dimension_numbers = #tpu.dot_dimension_numbers<[1], [0], [0], [1], [0, 0, 1, 1], [], []>} : vector<32x128xbf16>, vector<128x128xbf16>, vector<32x128xf32> -> vector<32x128xf32>
    %c4_i32 = arith.constant 4 : i32
    %5 = arith.muli %arg1, %c4_i32 : i32
    %c0_i32 = arith.constant 0 : i32
    %6 = arith.addi %5, %c0_i32 : i32
    %7 = arith.index_cast %6 : i32 to index
    %8 = memref.load %arg2[%7] : memref<8xf32, #tpu.memory_space<smem>>
    %c1 = arith.constant 1 : index
    %c0_5 = arith.constant 0 : index
    %c0_6 = arith.constant 0 : index
    %9 = vector.load %arg4[%c1, %c0_5, %c0_6] : memref<5x128x128xbf16, #tpu.memory_space<vmem>>, vector<1x128x128xbf16>
    %10 = vector.shape_cast %9 : vector<1x128x128xbf16> to vector<128x128xbf16>
    %cst_7 = arith.constant dense<0.000000e+00> : vector<32x128xf32>
    %11 = tpu.matmul %1, %10, %cst_7 {dimension_numbers = #tpu.dot_dimension_numbers<[1], [0], [0], [1], [0, 0, 1, 1], [], []>} : vector<32x128xbf16>, vector<128x128xbf16>, vector<32x128xf32> -> vector<32x128xf32>
    %12 = vector.broadcast %8 : f32 to vector<32x128xf32>
    %13 = arith.mulf %12, %11 : vector<32x128xf32>
    %14 = arith.addf %4, %13 : vector<32x128xf32>
    %c4_i32_8 = arith.constant 4 : i32
    %15 = arith.muli %arg1, %c4_i32_8 : i32
    %c1_i32 = arith.constant 1 : i32
    %16 = arith.addi %15, %c1_i32 : i32
    %17 = arith.index_cast %16 : i32 to index
    %18 = memref.load %arg2[%17] : memref<8xf32, #tpu.memory_space<smem>>
    %c2 = arith.constant 2 : index
    %c0_9 = arith.constant 0 : index
    %c0_10 = arith.constant 0 : index
    %19 = vector.load %arg4[%c2, %c0_9, %c0_10] : memref<5x128x128xbf16, #tpu.memory_space<vmem>>, vector<1x128x128xbf16>
    %20 = vector.shape_cast %19 : vector<1x128x128xbf16> to vector<128x128xbf16>
    %cst_11 = arith.constant dense<0.000000e+00> : vector<32x128xf32>
    %21 = tpu.matmul %1, %20, %cst_11 {dimension_numbers = #tpu.dot_dimension_numbers<[1], [0], [0], [1], [0, 0, 1, 1], [], []>} : vector<32x128xbf16>, vector<128x128xbf16>, vector<32x128xf32> -> vector<32x128xf32>
    %22 = vector.broadcast %18 : f32 to vector<32x128xf32>
    %23 = arith.mulf %22, %21 : vector<32x128xf32>
    %24 = arith.addf %14, %23 : vector<32x128xf32>
    %c4_i32_12 = arith.constant 4 : i32
    %25 = arith.muli %arg1, %c4_i32_12 : i32
    %c2_i32 = arith.constant 2 : i32
    %26 = arith.addi %25, %c2_i32 : i32
    %27 = arith.index_cast %26 : i32 to index
    %28 = memref.load %arg2[%27] : memref<8xf32, #tpu.memory_space<smem>>
    %c3 = arith.constant 3 : index
    %c0_13 = arith.constant 0 : index
    %c0_14 = arith.constant 0 : index
    %29 = vector.load %arg4[%c3, %c0_13, %c0_14] : memref<5x128x128xbf16, #tpu.memory_space<vmem>>, vector<1x128x128xbf16>
    %30 = vector.shape_cast %29 : vector<1x128x128xbf16> to vector<128x128xbf16>
    %cst_15 = arith.constant dense<0.000000e+00> : vector<32x128xf32>
    %31 = tpu.matmul %1, %30, %cst_15 {dimension_numbers = #tpu.dot_dimension_numbers<[1], [0], [0], [1], [0, 0, 1, 1], [], []>} : vector<32x128xbf16>, vector<128x128xbf16>, vector<32x128xf32> -> vector<32x128xf32>
    %32 = vector.broadcast %28 : f32 to vector<32x128xf32>
    %33 = arith.mulf %32, %31 : vector<32x128xf32>
    %34 = arith.addf %24, %33 : vector<32x128xf32>
    %c4_i32_16 = arith.constant 4 : i32
    %35 = arith.muli %arg1, %c4_i32_16 : i32
    %c3_i32 = arith.constant 3 : i32
    %36 = arith.addi %35, %c3_i32 : i32
    %37 = arith.index_cast %36 : i32 to index
    %38 = memref.load %arg2[%37] : memref<8xf32, #tpu.memory_space<smem>>
    %c4 = arith.constant 4 : index
    %c0_17 = arith.constant 0 : index
    %c0_18 = arith.constant 0 : index
    %39 = vector.load %arg4[%c4, %c0_17, %c0_18] : memref<5x128x128xbf16, #tpu.memory_space<vmem>>, vector<1x128x128xbf16>
    %40 = vector.shape_cast %39 : vector<1x128x128xbf16> to vector<128x128xbf16>
    %cst_19 = arith.constant dense<0.000000e+00> : vector<32x128xf32>
    %41 = tpu.matmul %1, %40, %cst_19 {dimension_numbers = #tpu.dot_dimension_numbers<[1], [0], [0], [1], [0, 0, 1, 1], [], []>} : vector<32x128xbf16>, vector<128x128xbf16>, vector<32x128xf32> -> vector<32x128xf32>
    %42 = vector.broadcast %38 : f32 to vector<32x128xf32>
    %43 = arith.mulf %42, %41 : vector<32x128xf32>
    %44 = arith.addf %34, %43 : vector<32x128xf32>
    %c0_20 = arith.constant 0 : index
    %c0_21 = arith.constant 0 : index
    %45 = vector.load %arg5[%c0_20, %c0_21] : memref<1x128xf32, #tpu.memory_space<vmem>>, vector<1x128xf32>
    %46 = vector.broadcast %45 : vector<1x128xf32> to vector<32x128xf32>
    %47 = arith.addf %44, %46 : vector<32x128xf32>
    %c0_22 = arith.constant 0 : index
    %c0_23 = arith.constant 0 : index
    %c0_24 = arith.constant 0 : index
    %48 = vector.load %arg6[%c0_22, %c0_23, %c0_24] : memref<1x32x128xf32, #tpu.memory_space<vmem>>, vector<1x32x128xf32>
    %49 = vector.shape_cast %48 : vector<1x32x128xf32> to vector<32x128xf32>
    %50 = vector.shape_cast %47 : vector<32x128xf32> to vector<1x32x128xf32>
    tpu.vector_store %arg6[%c0_22, %c0_23, %c0_24], %50 {strides = array<i32>} : memref<1x32x128xf32, #tpu.memory_space<vmem>>, vector<1x32x128xf32>,
    return
  }
  func.func @transform_0(%arg0: i32, %arg1: i32) -> i32 {
    %c0_i32 = arith.constant 0 : i32
    %c0_i32_0 = arith.constant 0 : i32
    return %c0_i32 : i32
  }
  func.func @transform_1(%arg0: i32, %arg1: i32) -> (i32, i32, i32) {
    %c0_i32 = arith.constant 0 : i32
    %c0_i32_0 = arith.constant 0 : i32
    %c0_i32_1 = arith.constant 0 : i32
    return %arg1, %c0_i32, %c0_i32_0 : i32, i32, i32
  }
  func.func @transform_2(%arg0: i32, %arg1: i32) -> (i32, i32, i32) {
    %c0_i32 = arith.constant 0 : i32
    %c0_i32_0 = arith.constant 0 : i32
    %c0_i32_1 = arith.constant 0 : i32
    return %c0_i32, %c0_i32_0, %arg0 : i32, i32, i32
  }
  func.func @transform_3(%arg0: i32, %arg1: i32) -> (i32, i32) {
    %c0_i32 = arith.constant 0 : i32
    %c0_i32_0 = arith.constant 0 : i32
    return %c0_i32, %arg0 : i32, i32
  }
  func.func @transform_4(%arg0: i32, %arg1: i32) -> (i32, i32, i32) {
    %c0_i32 = arith.constant 0 : i32
    %c0_i32_0 = arith.constant 0 : i32
    return %arg1, %c0_i32, %arg0 : i32, i32, i32
  }
}

</mosaic_0001>

<bundles_post_ra>
// kernel: skilled_ltsft_linear.1
= control target key start
LH: loop header
LB: loop body
LE: loop exit
PB: predicated region body
PF: predicated region fallthrough
CT: control target
= control target key end

     0   :  { %s1935_s0 = inlined_call_operand.vmem [shape: f32[8], index: 0, kind: input, shape index: {}]   ;;  %s1936_s1 = inlined_call_operand.vmem [shape: bf16[2,32,128], index: 1, kind: input, shape index: {}]   ;;  %s1937_s2 = inlined_call_operand.hbm [shape: bf16[5,128,256], index: 2, kind: input, shape index: {}]   ;;  %s1938_s3 = inlined_call_operand.vmem [shape: f32[1,256], index: 3, kind: input, shape index: {}]   ;;  %s1939_s4 = inlined_call_operand.vmem [shape: f32[2,32,256], index: 4, kind: output, shape index: {}]  }
   0x1   :  { %1945 = sst [smem:[#allocation12_spill]] %s1935_s0 }
   0x2   :  { %9 = vsyncpa [#allocation4], 0 }
   0x3   :  { %10 = vsyncpa [#allocation3], 0 }
   0x4   :  { %12 = vsyncpa [#allocation3 + $0x1], 0  ;;  %s1660_s15 = smov 0   ;;  %s1662_s16 = smov 0  }
   0x5   :  { %s1664_s17 = smov 0   ;;  %s1666_s18 = smov 0  }
   0x6   :  { %s1668_s19 = smov 0   ;;  %s1670_s20 = smov 0  }
   0x7   :  { %s1672_s21 = smov 0   ;;  %s1674_s22 = smov 0  }
   0x8   :  { %s1676_s23 = smov 0   ;;  %s1678_s24 = smov 0  }
   0x9 LB: > { %1946 = sst [smem:[#allocation9_spill]] %s1620_s22  ;;  %s1077_s25 = sadd.s32 4294967295, %s1628_s24   ;;  %s1628_s24 = sphi %s1678_s24, %s18_s24   ;;  %s1624_s23 = sphi %s1676_s23, %s1970_s23   ;;  %s1620_s22 = sphi %s1674_s22, %s1962_s22   ;;  %s1616_s21 = sphi %s1672_s21, %s1969_s21   ;;  %s1612_s20 = sphi %s1670_s20, %s1961_s20   ;;  %s1608_s19 = sphi %s1668_s19, %s1968_s19   ;;  %s1604_s18 = sphi %s1666_s18, %s1967_s18   ;;  %s1600_s17 = sphi %s1664_s17, %s1966_s17   ;;  %s1596_s16 = sphi %s1662_s16, %s1965_s16   ;;  %s1592_s15 = sphi %s1660_s15, %s1964_s15  }
   0xa   : > { %p91_p0 = scmp.ne.s32.totalorder %s1608_s19, %s1604_s18  ;;  %p92_p1 = scmp.eq.s32.totalorder %s1628_s24, 0 }
   0xb   : > { %p97_p2 = scmp.ne.s32.totalorder %s1604_s18, %s1600_s17  ;;  %p1714_p3 = scmp.eq.s32.totalorder %s1077_s25, 0 }
   0xc   : > { %p1718_p4 = por %p92_p1, %p91_p0  ;;  %p148_p6 = scmp.ne.s32.totalorder %s1596_s16, %s1592_s15 }
   0xd   : > { %p1725_p5 = por %p1714_p3, %p97_p2  ;;  %p149_p7 = scmp.eq.s32.totalorder %s1077_s25, 3 }
   0xe   : > { %p1079_p8 = scmp.ge.s32.totalorder %s1628_s24, 1  ;;  %p162_p9 = scmp.lt.s32.totalorder %s1628_s24, 5 }
   0xf   : > { %s1949_s30 = scalar_select %p1725_p5, 1, 0 }
  0x10   : > { %p1733_p10 = por %p149_p7, %p148_p6  ;;  %s1951_s0 = sld [smem:[#allocation12_spill]] }
  0x11   : > { %p1740_p11 = pnand %p1079_p8, %p162_p9  ;;  %p1369_p13 = scmp.lt.s32.totalorder %s1628_s24, 4 }
  0x12   : > { %s1950_s5 = scalar_select %p1733_p10, 1, 0 }
  0x13   : > { %s1952_s9 = scalar_select %p1740_p11, 1, 0 }
  0x14   : > { %p1360_p12 = pneg %p1740_p11  ;;  %p1751_p1 = pnand %p1369_p13, %p1718_p4 }
  0x16   : > { %s175_s8 = sshll.u32 %s1951_s0, 4  ;;  %p1361_p0 = pnand %p1360_p12, %p1714_p3  ;;  %s176_s8 = int_to_ptr.vmem [resolvable:$true] %s175_s8 }
  0x17   : > { %s1497_s11 = scalar_lea.vmem %s176_s8, 16  ;;  %p1505_p9 = scmp.lt.s32.totalorder %s176_s8, %s176_s8 }
  0x18   : > { %p1498_p2 = scmp.ne.s32.totalorder %s176_s8, %s1497_s11  ;;  %p1499_p6 = pneg %p1361_p0 }
  0x19   : > { %p1506_p10 = scmp.lt.s32.totalorder %s1497_s11, %s1497_s11 }
  0x1a   : > { %p1500_p7 = pnand %p1499_p6, %p1498_p2 }
  0x1b   : > { %p1507_p5 = por %p1506_p10, %p1505_p9 }
  0x1c   : > { %p1501_p8 = pneg %p1500_p7 }
  0x1e   : > { %p1508_p11 = pnand %p1507_p5, %p1501_p8 }
  0x20   : > { %1511 = shalt.err (!%p1508_p11)
}
  0x21   : > { %s1630_s12 = smov [#allocation2]   ;;  %s27_s13 = sadd.s32 1, %s1620_s22 }
  0x22   : > { %1363 = dma.vmem_to_smem (!%p1361_p0), %s176_s8, 16, %s1630_s12, [#allocation4]  }
  0x23   : > { %s30_s14 = sadd.s32 1, %s1624_s23  ;;  %p28_p4 = scmp.ge.s32.totalorder %s27_s13, 2 }
  0x24   : > { %s194_s17 = sand.u32 1, %s1608_s19   ;;  %s1082_s6 = sshll.u32 %s1624_s23, 6 }
  0x25   : > { %s1352_s25 = smul.u32 320, %s194_s17  ;;  %s1972_s13 = smov (%p28_p4, %s27_s13), 0 }
  0x26   : > { %1954 = sst [smem:[#allocation10_spill]] %s1972_s13  ;;  %s1974_s14 = smov (!%p28_p4, %s30_s14), %s1624_s23 }
  0x27   : > { %s133_s28 = ssub.s32 %s1620_s22, %s1972_s13  ;;  %p32_p5 = scmp.ge.s32.totalorder %s1974_s14, 2 }
  0x28   : > { %s1767_s11 = scalar_lea.hbm %s1937_s2, %s1082_s6  ;;  %s198_s12 = scalar_lea.vmem [#allocation5], %s1352_s25 }
  0x29   : > { %s204_s29 = sshll.u32 %s198_s12, 4  ;;  %s1976_s14 = smov (%p32_p5, %s1974_s14), 0  ;;  %s1771_s29 = int_to_ptr.vmem [resolvable:$true] %s204_s29 }
  0x2a   : > { %1955 = sst [smem:[#allocation11_spill]] %s1976_s14  ;;  %s81_s26 = ssub.s32 %s1624_s23, %s1976_s14 }
  0x2b   : > { %p82_p10 = scmp.eq.s32.totalorder %s81_s26, 0  ;;  %s135_s0 = sor.u32 %s133_s28, %s81_s26 }
  0x2c   : > { %p136_p11 = scmp.eq.s32.totalorder %s135_s0, 0  ;;  %s1956_s13 = sadd.s32 1, %s1608_s19 }
  0x2d   : > { %s1778_s7 = scalar_select %p82_p10, %s1608_s19, %s1956_s13  }
  0x2e   : > { %s1957_s6 = sadd.s32 1, %s1596_s16  ;;  %s1785_s22 = scalar_lea.sflag [#allocation3], %s194_s17 }
  0x2f   : > { %s1783_s8 = scalar_select %p136_p11, %s1596_s16, %s1957_s6  }
  0x30   : > { %s1512_s25 = scalar_lea.hbm %s1767_s11, 5120  ;;  %p1514_p13 = pneg %p1751_p1 }
  0x31   : > { %p1513_p12 = scmp.ne.s32.totalorder %s1767_s11, %s1512_s25  ;;  %s1517_s0 = scalar_lea.hbm %s1937_s2, 10240 }
  0x32   : > { %p1518_p6 = scmp.lt.u32.totalorder %s1767_s11, %s1937_s2  ;;  %p1519_p7 = scmp.lt.u32.totalorder %s1517_s0, %s1512_s25 }
  0x33   : > { %p1515_p0 = pnand %p1514_p13, %p1513_p12  ;;  %p1521_p9 = scmp.lt.u32.totalorder %s1512_s25, %s1767_s11 }
  0x34   : > { %p1520_p8 = por %p1519_p7, %p1518_p6 }
  0x35   : > { %p1516_p2 = pneg %p1515_p0 }
  0x36   : > { %p1522_p4 = por %p1521_p9, %p1520_p8 }
  0x38   : > { %p1523_p5 = pnand %p1522_p4, %p1516_p2 }
  0x3a   : > { %1526 = shalt.err (!%p1523_p5)
}
  0x3b   : > { %s1527_s17 = scalar_lea.vmem %s1771_s29, 5120  ;;  %s1631_s14 = smov [#allocation5]  }
  0x3c   : > { %p1528_p10 = scmp.ne.s32.totalorder %s1771_s29, %s1527_s17  ;;  %s1532_s28 = sshll.u32 %s1631_s14, 4  ;;  %s1533_s28 = int_to_ptr.vmem [resolvable:$false] %s1532_s28 }
  0x3d   : > { %s1534_s6 = scalar_lea.vmem %s1533_s28, 10240  ;;  %p1535_p0 = scmp.lt.s32.totalorder %s1771_s29, %s1533_s28 }
  0x3e   : > { %p1530_p11 = pnand %p1528_p10, %p1514_p13  ;;  %p1536_p6 = scmp.lt.s32.totalorder %s1534_s6, %s1527_s17 }
  0x40   : > { %p1531_p12 = pneg %p1530_p11  ;;  %p1537_p7 = por %p1536_p6, %p1535_p0 }
  0x42   : > { %p1538_p8 = pnand %p1537_p7, %p1531_p12 }
  0x44   : > { %1541 = shalt.err (!%p1538_p8)
}
  0x45   : > { %s1632_s25 = smov 128   ;;  %s1633_s12 = smov 64  }
  0x46   : > { %s1634_s0 = smov 4   ;;  %p1958_p13 = scmp.ne.s32.totalorder %s1952_s9, 0 }
  0x47   : > { %1367 = dma.hbm_to_vmem [thread:$0]  (!%p1751_p1), %s1767_s11, 5120, %s1771_s29, %s1785_s22, %s1632_s25, %s1633_s12, %s1634_s0  }
  0x48   : > { %222 = sbr.rel (%p1958_p13) target bundleno = 414 (0x19e), region = 36 }
  0x4f   : > { %1583 = dma.done.wait (%p1714_p3), [#allocation4], 16  }
  0x50   : > { %1585 = vsyncadd (%p1714_p3), [#allocation4], 4294967280  ;;  %s228_s26 = sand.u32 1, %s1604_s18   ;;  %p1959_p2 = scmp.ne.s32.totalorder %s1949_s30, 0 }
  0x51   : > { %s1353_s13 = smul.u32 320, %s228_s26  ;;  %s229_s17 = scalar_lea.sflag [#allocation3], %s228_s26 }
  0x53   : > { %s1820_s14 = scalar_lea.vmem [#allocation5], %s1353_s13 }
  0x54   : > { %1587 = dma.done.wait (%p1959_p2), %s229_s17, 5120  }
  0x55   : > { %1589 = vsyncadd (%p1959_p2), %s229_s17, 4294962176 }
  0x56   : > { %237 = sfence }
  0x57   : > { %v1455_v0 = vld [vmem:[%s1820_s14 + $0x40] sm:$0xff]   ;;  %v1457_v2 = vld [vmem:[%s1820_s14 + $0x48] sm:$0xff]   ;;  %p265_p3 = scmp.lt.s32.totalorder %s1612_s20, 1  ;;  %v1459_v4 = vld [vmem:[%s1820_s14 + $0x50] sm:$0xff]   ;;  %s1886_s10 = sshll.u32 %s1612_s20, 2 }
  0x58   : > { %v1456_v1 = vld [vmem:[%s1820_s14] sm:$0xff]   ;;  %1252 = vmatprep.subr.bf16.mxu0 %v1455_v0  ;;  %v1458_v3 = vld [vmem:[%s1820_s14 + $0x8] sm:$0xff]   ;;  %v1460_v5 = vld [vmem:[%s1820_s14 + $0x10] sm:$0xff]   ;;  %s295_s11 = sld [smem:[#allocation2 + %s1886_s10]]  ;;  %s524_s28 = sadd.s32 1, %s1886_s10 }
  0x59   : > { %1253 = vmatpush3.bf16.msra.mxu0 %v1455_v0  ;;  %1272 = vmatprep.subr.bf16.mxu1 %v1456_v1  ;;  %s266_s22 = scalar_select %p265_p3, %s1612_s20, 1  ;;  %v1461_v6 = vld [vmem:[%s1820_s14 + $0x58] sm:$0xff]   ;;  %v1463_v8 = vld [vmem:[%s1820_s14 + $0x60] sm:$0xff]   ;;  %v1465_v10 = vld [vmem:[%s1820_s14 + $0x68] sm:$0xff]  }
  0x5a   : > { %1273 = vmatpush3.bf16.msra.mxu1 %v1456_v1  ;;  %1254 = vmatprep.subr.bf16.mxu0 %v1457_v2  ;;  %v1462_v7 = vld [vmem:[%s1820_s14 + $0x18] sm:$0xff]   ;;  %v1464_v9 = vld [vmem:[%s1820_s14 + $0x20] sm:$0xff]   ;;  %v1466_v12 = vld [vmem:[%s1820_s14 + $0x28] sm:$0xff]   ;;  %s649_s6 = sadd.s32 2, %s1886_s10  ;;  %s525_s25 = sld [smem:[#allocation2 + %s524_s28]] }
  0x5b   : > { %1274 = vmatprep.subr.bf16.mxu1 %v1458_v3  ;;  %s1201_s27 = sshll.u32 %s266_s22, 4  ;;  %v1467_v13 = vld [vmem:[%s1820_s14 + $0x70] sm:$0xff]   ;;  %v1469_v15 = vld [vmem:[%s1820_s14 + $0x78] sm:$0xff]   ;;  %v1473_v17 = vld [vmem:[%s1820_s14 + $0x80] sm:$0xff]   ;;  %s650_s12 = sld [smem:[#allocation2 + %s649_s6]] }
  0x5c   : > { %s269_s9 = scalar_lea.vmem %s1936_s1, %s1201_s27  ;;  %v1468_v14 = vld [vmem:[%s1820_s14 + $0x30] sm:$0xff]   ;;  %v1470_v16 = vld [vmem:[%s1820_s14 + $0x38] sm:$0xff]   ;;  %v1474_v18 = vld [vmem:[%s1820_s14 + $0xc0] sm:$0xff]   ;;  %s774_s0 = sadd.s32 3, %s1886_s10 }
  0x5d   : > { %1255 = vmatpush3.bf16.msra.mxu0 %v1457_v2  ;;  %v1842_v11 = vld [vmem:[%s269_s9] sm:$0xff]   ;;  %v1853_v19 = vld [vmem:[%s269_s9 + $0x8] sm:$0xff]   ;;  %v1477_v22 = vld [vmem:[%s1820_s14 + $0x90] sm:$0xff]   ;;  %s775_s26 = sld [smem:[#allocation2 + %s774_s0]]  ;;  %p270_p1 = scmp.lt.s32.totalorder %s1616_s21, 1 }
  0x5e   : > { %1275 = vmatpush3.bf16.msra.mxu1 %v1458_v3  ;;  %1256 = vmatprep.subr.bf16.mxu0 %v1459_v4  ;;  %v1475_v20 = vld [vmem:[%s1820_s14 + $0x88] sm:$0xff]   ;;  %v1478_v23 = vld [vmem:[%s1820_s14 + $0xd0] sm:$0xff]   ;;  %v1479_v24 = vld [vmem:[%s1820_s14 + $0x98] sm:$0xff]   ;;  %v422_v42 = vstv %s295_s11  ;;  %s262_s17 = sand.u32 1, %s1592_s15   ;;  %p1960_p9 = scmp.ne.s32.totalorder %s1950_s5, 0 }
  0x5f   : > { %1276 = vmatprep.subr.bf16.mxu1 %v1460_v5  ;;  %1268 = vmatprep.mubr.bf16.mxu0 %v1842_v11  ;;  %v1476_v21 = vld [vmem:[%s1820_s14 + $0xc8] sm:$0xff]   ;;  %v1480_v25 = vld [vmem:[%s1820_s14 + $0xd8] sm:$0xff]   ;;  %v1481_v26 = vld [vmem:[%s1820_s14 + $0xa0] sm:$0xff]   ;;  %s271_s13 = scalar_select %p270_p1, %s1616_s21, 1 }
  0x60   : > { %1288 = vmatprep.mubr.bf16.mxu1 %v1842_v11  ;;  %v1482_v27 = vld [vmem:[%s1820_s14 + $0xe0] sm:$0xff]   ;;  %v1483_v28 = vld [vmem:[%s1820_s14 + $0xa8] sm:$0xff]   ;;  %v1485_v30 = vld [vmem:[%s1820_s14 + $0xb0] sm:$0xff]   ;;  %v640_v59 = vstv %s525_s25  ;;  %s1085_s29 = sshll.u32 %s262_s17, 5  ;;  %s1197_s30 = sshll.u32 (%p1960_p9), %s1612_s20, 3 }
  0x61   : > { %1257 = vmatpush3.bf16.msra.mxu0 %v1459_v4  ;;  %v1484_v29 = vld [vmem:[%s1820_s14 + $0xe8] sm:$0xff]   ;;  %v1486_v31 = vld [vmem:[%s1820_s14 + $0xf0] sm:$0xff]   ;;  %v1487_v32 = vld [vmem:[%s1820_s14 + $0xb8] sm:$0xff]   ;;  %v765_v60 = vstv %s650_s12  ;;  %s272_s27 = scalar_lea.vmem %s1938_s3, %s271_s13  ;;  %s264_s15 = scalar_lea.vmem [#allocation6], %s1085_s29 }
  0x62   : > { %1277 = vmatpush3.bf16.msra.mxu1 %v1460_v5  ;;  %1258 = vmatprep.subr.bf16.mxu0 %v1461_v6  ;;  %v1488_v33 = vld [vmem:[%s1820_s14 + $0xf8] sm:$0xff]   ;;  %v1489_v34 = vld [vmem:[%s1820_s14 + $0x100] sm:$0xff]   ;;  %v1490_v35 = vld [vmem:[%s1820_s14 + $0x108] sm:$0xff]   ;;  %s922_s9 = sadd.s32 (%p1960_p9), %s1616_s21, %s1197_s30 }
  0x63   : > { %1278 = vmatprep.subr.bf16.mxu1 %v1462_v7  ;;  %v1491_v36 = vld [vmem:[%s1820_s14 + $0x110] sm:$0xff]   ;;  %v1492_v37 = vld [vmem:[%s1820_s14 + $0x118] sm:$0xff]   ;;  %v1493_v38 = vld [vmem:[%s1820_s14 + $0x120] sm:$0xff]   ;;  %s1198_s10 = sshll.u32 (%p1960_p9), %s922_s9, 3 }
  0x64   : > { %v1494_v39 = vld [vmem:[%s1820_s14 + $0x128] sm:$0xff]   ;;  %v1495_v40 = vld [vmem:[%s1820_s14 + $0x130] sm:$0xff]   ;;  %v1496_v41 = vld [vmem:[%s1820_s14 + $0x138] sm:$0xff]   ;;  %s924_s6 = scalar_lea.vmem (%p1960_p9), %s1939_s4, %s1198_s10 }
  0x65   : > { %1259 = vmatpush3.bf16.msra.mxu0 %v1461_v6 }
  0x66   : > { %1279 = vmatpush3.bf16.msra.mxu1 %v1462_v7  ;;  %1260 = vmatprep.subr.bf16.mxu0 %v1463_v8 }
  0x67   : > { %1280 = vmatprep.subr.bf16.mxu1 %v1464_v9 }
  0x69   : > { %1261 = vmatpush3.bf16.msra.mxu0 %v1463_v8 }
  0x6a   : > { %1281 = vmatpush3.bf16.msra.mxu1 %v1464_v9  ;;  %1262 = vmatprep.subr.bf16.mxu0 %v1465_v10 }
  0x6b   : > { %1282 = vmatprep.subr.bf16.mxu1 %v1466_v12 }
  0x6d   : > { %1263 = vmatpush3.bf16.msra.mxu0 %v1465_v10 }
  0x6e   : > { %1283 = vmatpush3.bf16.msra.mxu1 %v1466_v12  ;;  %1264 = vmatprep.subr.bf16.mxu0 %v1467_v13 }
  0x6f   : > { %1284 = vmatprep.subr.bf16.mxu1 %v1468_v14 }
  0x71   : > { %1265 = vmatpush3.bf16.msra.mxu0 %v1467_v13 }
  0x72   : > { %1285 = vmatpush3.bf16.msra.mxu1 %v1468_v14  ;;  %1266 = vmatprep.subr.bf16.mxu0 %v1469_v15 }
  0x73   : > { %1286 = vmatprep.subr.bf16.mxu1 %v1470_v16 }
  0x75   : > { %1267 = vmatpush3.bf16.msra.mxu0 %v1469_v15 }
  0x76   : > { %1287 = vmatpush3.bf16.msra.mxu1 %v1470_v16  ;;  %1292 = vmatprep.subr.bf16.mxu0 %v1473_v17 }
  0x77   : > { %1312 = vmatprep.subr.bf16.mxu1 %v1474_v18 }
  0x78   : > { %1269 = vmatmul.mubr.bf16.vlgmr.msra.gmra.mrb[0].mxu0 %v1853_v19 }
  0x79   : > { %1293 = vmatpush3.bf16.msra.mxu0 %v1473_v17  ;;  %1289 = vmatmul.mubr.bf16.vlgmr.msra.gmra.mrb[0].mxu1 %v1853_v19 }
  0x7a   : > { %1313 = vmatpush3.bf16.msra.mxu1 %v1474_v18  ;;  %1294 = vmatprep.subr.bf16.mxu0 %v1475_v20 }
  0x7b   : > { %1314 = vmatprep.subr.bf16.mxu1 %v1476_v21  ;;  %1308 = vmatprep.mubr.bf16.mxu0 %v1842_v11 }
  0x7c   : > { %1328 = vmatprep.mubr.bf16.mxu1 %v1842_v11 }
  0x7d   : > { %1295 = vmatpush3.bf16.msra.mxu0 %v1475_v20 }
  0x7e   : > { %1315 = vmatpush3.bf16.msra.mxu1 %v1476_v21  ;;  %1296 = vmatprep.subr.bf16.mxu0 %v1477_v22  ;;  %v890_v21 = vstv %s775_s26 }
  0x7f   : > { %1316 = vmatprep.subr.bf16.mxu1 %v1478_v23 }
  0x81   : > { %1297 = vmatpush3.bf16.msra.mxu0 %v1477_v22 }
  0x82   : > { %1317 = vmatpush3.bf16.msra.mxu1 %v1478_v23  ;;  %1298 = vmatprep.subr.bf16.mxu0 %v1479_v24 }
  0x83   : > { %1318 = vmatprep.subr.bf16.mxu1 %v1480_v25 }
  0x85   : > { %1299 = vmatpush3.bf16.msra.mxu0 %v1479_v24 }
  0x86   : > { %1319 = vmatpush3.bf16.msra.mxu1 %v1480_v25  ;;  %1300 = vmatprep.subr.bf16.mxu0 %v1481_v26  ;;  %v1195_v25 = vld [vmem:[%s272_s27] ss:$0 sm:$0xff] }
  0x87   : > { %1320 = vmatprep.subr.bf16.mxu1 %v1482_v27 }
  0x89   : > { %1301 = vmatpush3.bf16.msra.mxu0 %v1481_v26 }
  0x8a   : > { %1321 = vmatpush3.bf16.msra.mxu1 %v1482_v27  ;;  %1302 = vmatprep.subr.bf16.mxu0 %v1483_v28 }
  0x8b   : > { %1322 = vmatprep.subr.bf16.mxu1 %v1484_v29 }
  0x8d   : > { %1303 = vmatpush3.bf16.msra.mxu0 %v1483_v28 }
  0x8e   : > { %1323 = vmatpush3.bf16.msra.mxu1 %v1484_v29  ;;  %1304 = vmatprep.subr.bf16.mxu0 %v1485_v30 }
  0x8f   : > { %1324 = vmatprep.subr.bf16.mxu1 %v1486_v31 }
  0x91   : > { %1305 = vmatpush3.bf16.msra.mxu0 %v1485_v30 }
  0x92   : > { %1325 = vmatpush3.bf16.msra.mxu1 %v1486_v31  ;;  %1306 = vmatprep.subr.bf16.mxu0 %v1487_v32 }
  0x93   : > { %1326 = vmatprep.subr.bf16.mxu1 %v1488_v33 }
  0x95   : > { %1307 = vmatpush3.bf16.msra.mxu0 %v1487_v32 }
  0x96   : > { %1327 = vmatpush3.bf16.msra.mxu1 %v1488_v33  ;;  %1332 = vmatprep.subr.bf16.mxu0 %v1489_v34 }
  0x98   : > { %1309 = vmatmul.mubr.bf16.vlgmr.msra.gmra.mrb[4].mxu0 %v1853_v19 }
  0x99   : > { %1333 = vmatpush3.bf16.msra.mxu0 %v1489_v34  ;;  %1329 = vmatmul.mubr.bf16.vlgmr.msra.gmra.mrb[4].mxu1 %v1853_v19 }
  0x9a   : > { %1334 = vmatprep.subr.bf16.mxu0 %v1490_v35  ;;  %1348 = vmatprep.mubr.bf16.mxu0 %v1842_v11 }
  0x9d   : > { %1335 = vmatpush3.bf16.msra.mxu0 %v1490_v35 }
  0x9e   : > { %1336 = vmatprep.subr.bf16.mxu0 %v1491_v36 }
  0xa1   : > { %1337 = vmatpush3.bf16.msra.mxu0 %v1491_v36 }
  0xa2   : > { %1338 = vmatprep.subr.bf16.mxu0 %v1492_v37 }
  0xa5   : > { %1339 = vmatpush3.bf16.msra.mxu0 %v1492_v37 }
  0xa6   : > { %1340 = vmatprep.subr.bf16.mxu0 %v1493_v38 }
  0xa9   : > { %1341 = vmatpush3.bf16.msra.mxu0 %v1493_v38 }
  0xaa   : > { %1342 = vmatprep.subr.bf16.mxu0 %v1494_v39 }
  0xad   : > { %1343 = vmatpush3.bf16.msra.mxu0 %v1494_v39 }
  0xae   : > { %1344 = vmatprep.subr.bf16.mxu0 %v1495_v40 }
  0xb1   : > { %1345 = vmatpush3.bf16.msra.mxu0 %v1495_v40 }
  0xb2   : > { %1346 = vmatprep.subr.bf16.mxu0 %v1496_v41 }
  0xb5   : > { %1347 = vmatpush3.bf16.msra.mxu0 %v1496_v41 }
  0xb8   : > { %1349 = vmatmul.mubr.bf16.vlgmr.msra.gmra.mrb[8].mxu0 %v1853_v19 }
 0x14b   : > { %v1270_v43 = vpop.f32.mrb[0].mxu0 }
 0x14c   : > { %v425_v44 = vmul.f32 %v1270_v43, %v422_v42  ;;  %v407_v45 = vpop.f32.mrb[1].mxu0  ;;  %v1290_v46 = vpop.f32.mrb[0].mxu1 }
 0x14d   : > { %v423_v47 = vmul.f32 %v422_v42, %v407_v45  ;;  %v1271_v48 = vpop.f32.mrb[2].mxu0  ;;  %v509_v49 = vpop.f32.mrb[1].mxu1 }
 0x14e   : > { %v426_v50 = vmul.f32 %v1271_v48, %v422_v42  ;;  %v518_v51 = vadd.f32 %v1290_v46, %v425_v44  ;;  %v410_v52 = vpop.f32.mrb[3].mxu0  ;;  %v1291_v53 = vpop.f32.mrb[2].mxu1 }
 0x14f   : > { %v424_v54 = vmul.f32 %v422_v42, %v410_v52  ;;  %v510_v55 = vadd.f32 %v509_v49, %v423_v47  ;;  %v512_v56 = vpop.f32.mrb[3].mxu1 }
 0x150   : > { %v521_v57 = vadd.f32 %v1291_v53, %v426_v50 }
 0x151   : > { %v513_v58 = vadd.f32 %v512_v56, %v424_v54 }
 0x16b   : > { %v1310_v61 = vpop.f32.mrb[4].mxu0 }
 0x16c   : > { %v643_v62 = vmul.f32 %v1310_v61, %v640_v59  ;;  %v625_v63 = vpop.f32.mrb[5].mxu0  ;;  %v1330_v0 = vpop.f32.mrb[4].mxu1 }
 0x16d   : > { %v641_v1 = vmul.f32 %v640_v59, %v625_v63  ;;  %v1311_v2 = vpop.f32.mrb[6].mxu0  ;;  %v768_v3 = vmul.f32 %v1330_v0, %v765_v60  ;;  %v750_v4 = vpop.f32.mrb[5].mxu1 }
 0x16e   : > { %v647_v5 = vadd.f32 %v643_v62, %v518_v51  ;;  %v644_v6 = vmul.f32 %v1311_v2, %v640_v59  ;;  %v628_v7 = vpop.f32.mrb[7].mxu0  ;;  %v766_v8 = vmul.f32 %v765_v60, %v750_v4  ;;  %v1331_v9 = vpop.f32.mrb[6].mxu1 }
 0x16f   : > { %v645_v10 = vadd.f32 %v641_v1, %v510_v55  ;;  %v642_v11 = vmul.f32 %v640_v59, %v628_v7  ;;  %v769_v12 = vmul.f32 %v1331_v9, %v765_v60  ;;  %v753_v13 = vpop.f32.mrb[7].mxu1 }
 0x170   : > { %v648_v14 = vadd.f32 %v644_v6, %v521_v57  ;;  %v772_v15 = vadd.f32 %v768_v3, %v647_v5  ;;  %v767_v16 = vmul.f32 %v765_v60, %v753_v13 }
 0x171   : > { %v646_v17 = vadd.f32 %v642_v11, %v513_v58  ;;  %v770_v18 = vadd.f32 %v766_v8, %v645_v10 }
 0x172   : > { %v773_v19 = vadd.f32 %v769_v12, %v648_v14 }
 0x173   : > { %v771_v20 = vadd.f32 %v767_v16, %v646_v17 }
 0x18b   : > { %v1350_v22 = vpop.f32.mrb[8].mxu0 }
 0x18c   : > { %v893_v23 = vmul.f32 %v1350_v22, %v890_v21  ;;  %v875_v24 = vpop.f32.mrb[9].mxu0 }
 0x18d   : > { %v891_v26 = vmul.f32 %v890_v21, %v875_v24  ;;  %v1351_v27 = vpop.f32.mrb[10].mxu0 }
 0x18e   : > { %v897_v28 = vadd.f32 %v893_v23, %v772_v15  ;;  %v894_v29 = vmul.f32 %v1351_v27, %v890_v21  ;;  %v878_v30 = vpop.f32.mrb[11].mxu0 }
 0x18f   : > { %v895_v31 = vadd.f32 %v891_v26, %v770_v18  ;;  %v892_v32 = vmul.f32 %v890_v21, %v878_v30  ;;  %920 = sbr.rel (!%p1960_p9) target bundleno = 414 (0x19e), region = 48 }
 0x190   : > { %v908_v33 = vadd.f32 %v1195_v25, %v897_v28  ;;  %v898_v34 = vadd.f32 %v894_v29, %v773_v19 }
 0x191   : > { %v906_v35 = vadd.f32 %v1195_v25, %v895_v31  ;;  %v896_v36 = vadd.f32 %v892_v32, %v771_v20 }
 0x192   : > { %912 = vst [vmem:[%s264_s15 + $0x10] sm:$0xff] %v908_v33  ;;  %v909_v37 = vadd.f32 %v1195_v25, %v898_v34 }
 0x193   : > { %910 = vst [vmem:[%s264_s15] sm:$0xff] %v906_v35  ;;  %v907_v38 = vadd.f32 %v1195_v25, %v896_v36 }
 0x194   : > { %913 = vst [vmem:[%s264_s15 + $0x18] sm:$0xff] %v909_v37 }
 0x195   : > { %911 = vst [vmem:[%s264_s15 + $0x8] sm:$0xff] %v907_v38 }
 0x199   : > { %v962_v41 = vld [vmem:[%s264_s15 + $0x10] sm:$0xff] }
 0x19a   : > { %v958_v39 = vld [vmem:[%s264_s15] sm:$0xff]  ;;  %963 = vst [vmem:[%s924_s6 + $0x20] sm:$0xff] %v962_v41 }
 0x19b   : > { %v964_v42 = vld [vmem:[%s264_s15 + $0x18] sm:$0xff]  ;;  %959 = vst [vmem:[%s924_s6] sm:$0xff] %v958_v39 }
 0x19c   : > { %v960_v40 = vld [vmem:[%s264_s15 + $0x8] sm:$0xff]  ;;  %965 = vst [vmem:[%s924_s6 + $0x30] sm:$0xff] %v964_v42 }
 0x19d   : > { %961 = vst [vmem:[%s924_s6 + $0x10] sm:$0xff] %v960_v40 }
 0x19e PF: > { %s18_s24 = sadd.s32 1, %s1628_s24   ;;  %s1961_s20 = sld [smem:[#allocation9_spill]] }
 0x19f   : > { %p15_p4 = scmp.ge.s32.totalorder %s18_s24, 6   ;;  %s1962_s22 = sld [smem:[#allocation10_spill]] }
 0x1a0   : > { %s1963_s5 = sld [smem:[#allocation11_spill]]  ;;  %s1964_s15 = smov %s1596_s16 }
 0x1a1   : > { %s1965_s16 = smov %s1783_s8  ;;  %s1966_s17 = smov %s1604_s18 }
 0x1a2   : > { %s1967_s18 = smov %s1608_s19  ;;  %s1968_s19 = smov %s1778_s7 }
 0x1a3   : > { %s1969_s21 = smov %s1624_s23  ;;  %17 = sbr.rel (!%p15_p4) target bundleno = 9 (0x9), region = 129 }
 0x1a6   : > { %s1970_s23 = smov %s1963_s5 }
 0x1aa   :  { %981 = vsyncpa [#allocation3], 1 }
 0x1ab   :  { %983 = vsyncpa [#allocation3 + $0x1], 1 }
 0x1ac   :  { %984 = vsyncpa [#allocation4], 1 }
 0x1ad   :  { %986 = vsyncpa [#allocation4 + $0x1], 1 }

</bundles_post_ra>
